<compile_context>
chip_gen: v5e
topology: v5e:2x2
jax: 0.10.0
libtpu: 0.0.40
codegen_flags: <defaults>
</compile_context>

<pallas_src>
import numpy as np

import jax
import jax.numpy as jnp
from jax.experimental import pallas as pl
from jax.experimental.pallas import tpu as pltpu


def _base_node_kernel(v_threshold: float, v_reset: float):
    def kernel(x_ref, v_ref, spike_ref, v_out_ref):
        # neuronal_charge (IF): v = v + x
        v = v_ref[...] + x_ref[...]
        # neuronal_fire: heaviside(v - v_threshold); ties (==) fire -> 1
        fired = v >= jnp.asarray(v_threshold, v.dtype)
        spike_ref[...] = fired.astype(spike_ref.dtype)
        # neuronal_reset (hard reset) via a single select
        v_out_ref[...] = jnp.where(fired, jnp.asarray(v_reset, v.dtype), v)

    return kernel


def _round_up(a: int, m: int) -> int:
    return ((a + m - 1) // m) * m


def _sublane_multiple(*dtypes) -> int:
    """Packed-sublane tile height for the narrowest participating dtype."""
    m = 8
    for dt in dtypes:
        bits = np.dtype(dt).itemsize * 8
        if bits == 16:
            m = max(m, 16)
        elif bits <= 8:
            m = max(m, 32)
    return m


def _is_v7x() -> bool:
    try:
        kind = jax.devices()[0].device_kind.lower()
    except Exception:
        kind = ""
    return ("v7" in kind) or ("tpu7" in kind)


def base_node_forward(x, v, v_threshold=0.5, v_reset=0.0, spike_dtype=jnp.bfloat16):
    """One step of BaseNode.forward.

    x : [B, C, H, W] input (NCHW, matching the PyTorch module)
    v : [B, C, H, W] membrane potential state (consumed / updated in place)
    returns (spike, v_new), both [B, C, H, W]; spike in `spike_dtype`.
    """
    orig_shape = x.shape
    dtype = x.dtype
    n = x.size
    if spike_dtype is None:
        spike_dtype = dtype

    # ---- lane-dense 2D slab (zero-copy reshape in the common case) ----------
    lanes = None
    for cand in (1024, 512, 256, 128):
        if n % cand == 0:
            lanes = cand
            break

    xf = jnp.ravel(x)
    vf = jnp.ravel(v)
    padded = False
    if lanes is None:
        # Ragged fallback (rare for NCHW activations): pad once. Note: if
        # v_threshold <= 0 the zero pad "fires" and gets v_reset written -- it
        # is sliced off below, so this is harmless.
        lanes = 1024
        rows = pl.cdiv(n, lanes)
        pad = rows * lanes - n
        xf = jnp.pad(xf, (0, pad))
        vf = jnp.pad(vf, (0, pad))
        padded = True
    else:
        rows = n // lanes

    x2 = xf.reshape(rows, lanes)
    v2 = vf.reshape(rows, lanes)

    # ---- generation-aware tile selection -------------------------------------
    sub = _sublane_multiple(dtype, spike_dtype)
    v7x = _is_v7x()
    tr_max = 1024 if v7x else 512                 # 4 MiB vs 2 MiB f32 tiles
    vmem_limit = (48 if v7x else 32) * 1024 * 1024

    if rows < 2 * sub:
        # Too small to split into sublane-aligned blocks: one full-array block
        # (full-array blocks are exempt from the (sub,128) divisibility rule).
        tr = rows
    else:
        # >= 2 grid steps so both v7x TensorCores get work; tr is a multiple of
        # the sublane tile; a partial (masked) last block is allowed.
        tr = min(tr_max, _round_up(pl.cdiv(rows, 2), sub))
    grid_steps = pl.cdiv(rows, tr)

    itemsize = np.dtype(dtype).itemsize
    cost = pl.CostEstimate(
        flops=3 * n,
        transcendentals=0,
        bytes_accessed=n * (3 * itemsize + np.dtype(spike_dtype).itemsize),
    )

    spec = pl.BlockSpec((tr, lanes), lambda i: (i, 0))
    spike2, v_new2 = pl.pallas_call(
        _base_node_kernel(float(v_threshold), float(v_reset)),
        out_shape=(
            jax.ShapeDtypeStruct((rows, lanes), spike_dtype),
            jax.ShapeDtypeStruct((rows, lanes), dtype),
        ),
        grid_spec=pltpu.PrefetchScalarGridSpec(
            num_scalar_prefetch=0,
            grid=(grid_steps,),
            in_specs=[spec, spec],
            out_specs=[spec, spec],
        ),
        # v (input 1) is the persistent membrane state -> alias to v_out (output 1)
        input_output_aliases={1: 1},
        cost_estimate=cost,
        compiler_params=pltpu.CompilerParams(
            dimension_semantics=("parallel",),     # shards across v7x's 2 TCs
            vmem_limit_bytes=vmem_limit,
        ),
    )(x2, v2)

    if padded:
        spike = spike2.reshape(-1)[:n].reshape(orig_shape)
        v_new = v_new2.reshape(-1)[:n].reshape(orig_shape)
    else:
        spike = spike2.reshape(orig_shape)
        v_new = v_new2.reshape(orig_shape)
    return spike, v_new


if __name__ == "__main__":
    key = jax.random.PRNGKey(0)
    B, C, H, W = 2, 4, 16, 16
    x = jax.random.normal(key, (B, C, H, W), dtype=jnp.float32)

    v_threshold = 0.5
    v_reset = 0.0
    # initial membrane potential == v_reset (register_memory('v', v_reset))
    v0 = jnp.full((B, C, H, W), v_reset, dtype=jnp.float32)

    # pure-JAX reference (computed BEFORE the call: v may be aliased into the
    # kernel output via input_output_aliases)
    v_chk = v0 + x
    spike_chk = (v_chk - v_threshold >= 0.0).astype(jnp.float32)
    v_chk = (1.0 - spike_chk) * v_chk + spike_chk * v_reset

    spike, v_new = base_node_forward(x, v0, v_threshold, v_reset)
    spike = jax.block_until_ready(spike)
    v_new = jax.block_until_ready(v_new)

    assert spike.shape == (B, C, H, W) and v_new.shape == (B, C, H, W)
    assert jnp.allclose(spike.astype(jnp.float32), spike_chk), "spike mismatch"
    assert jnp.allclose(v_new, v_chk), "v mismatch"

    print("KERNEL_OK")
</pallas_src>

<mosaic_0001>
module attributes {stable_mosaic.version = 11 : i64} {
  func.func @kernel(%arg0: i32, %arg1: memref<2x1024xf32, #tpu.memory_space<vmem>>, %arg2: memref<2x1024xf32, #tpu.memory_space<vmem>>, %arg3: memref<2x1024xbf16, #tpu.memory_space<vmem>>, %arg4: memref<2x1024xf32, #tpu.memory_space<vmem>>) attributes {dimension_semantics = [#tpu.dimension_semantics<parallel>], iteration_bounds = array<i64: 1>, scalar_prefetch = 0 : i64, scratch_operands = 0 : i64, tpu.core_type = #tpu.core_type<tc>, window_params = [{transform_indices = @transform_0, window_bounds = array<i64: 2, 1024>}, {transform_indices = @transform_1, window_bounds = array<i64: 2, 1024>}, {transform_indices = @transform_2, window_bounds = array<i64: 2, 1024>}, {transform_indices = @transform_3, window_bounds = array<i64: 2, 1024>}]} {
    %c0 = arith.constant 0 : index
    %c0_0 = arith.constant 0 : index
    %0 = vector.load %arg2[%c0, %c0_0] : memref<2x1024xf32, #tpu.memory_space<vmem>>, vector<2x1024xf32>
    %c0_1 = arith.constant 0 : index
    %c0_2 = arith.constant 0 : index
    %1 = vector.load %arg1[%c0_1, %c0_2] : memref<2x1024xf32, #tpu.memory_space<vmem>>, vector<2x1024xf32>
    %2 = arith.addf %0, %1 : vector<2x1024xf32>
    %cst = arith.constant 5.000000e-01 : f32
    %3 = vector.broadcast %cst : f32 to vector<2x1024xf32>
    %4 = arith.cmpf oge, %2, %3 : vector<2x1024xf32>
    %5 = arith.extui %4 : vector<2x1024xi1> to vector<2x1024xi32>
    %6 = arith.sitofp %5 : vector<2x1024xi32> to vector<2x1024xf32>
    %7 = arith.truncf %6 : vector<2x1024xf32> to vector<2x1024xbf16>
    %c0_3 = arith.constant 0 : index
    %c0_4 = arith.constant 0 : index
    %8 = vector.load %arg3[%c0_3, %c0_4] : memref<2x1024xbf16, #tpu.memory_space<vmem>>, vector<2x1024xbf16>
    tpu.vector_store %arg3[%c0_3, %c0_4], %7 {strides = array<i32>} : memref<2x1024xbf16, #tpu.memory_space<vmem>>, vector<2x1024xbf16>,
    %cst_5 = arith.constant 0.000000e+00 : f32
    %9 = vector.broadcast %cst_5 : f32 to vector<2x1024xf32>
    %10 = arith.select %4, %9, %2 : vector<2x1024xi1>, vector<2x1024xf32>
    %c0_6 = arith.constant 0 : index
    %c0_7 = arith.constant 0 : index
    %11 = vector.load %arg4[%c0_6, %c0_7] : memref<2x1024xf32, #tpu.memory_space<vmem>>, vector<2x1024xf32>
    tpu.vector_store %arg4[%c0_6, %c0_7], %10 {strides = array<i32>} : memref<2x1024xf32, #tpu.memory_space<vmem>>, vector<2x1024xf32>,
    return
  }
  func.func @transform_0(%arg0: i32) -> (i32, i32) {
    %c0_i32 = arith.constant 0 : i32
    %c0_i32_0 = arith.constant 0 : i32
    return %arg0, %c0_i32 : i32, i32
  }
  func.func @transform_1(%arg0: i32) -> (i32, i32) {
    %c0_i32 = arith.constant 0 : i32
    %c0_i32_0 = arith.constant 0 : i32
    return %arg0, %c0_i32 : i32, i32
  }
  func.func @transform_2(%arg0: i32) -> (i32, i32) {
    %c0_i32 = arith.constant 0 : i32
    %c0_i32_0 = arith.constant 0 : i32
    return %arg0, %c0_i32 : i32, i32
  }
  func.func @transform_3(%arg0: i32) -> (i32, i32) {
    %c0_i32 = arith.constant 0 : i32
    %c0_i32_0 = arith.constant 0 : i32
    return %arg0, %c0_i32 : i32, i32
  }
}

</mosaic_0001>

<bundles_post_ra>
// kernel: tpu_custom_call.1
= control target key start
LH: loop header
LB: loop body
LE: loop exit
PB: predicated region body
PF: predicated region fallthrough
CT: control target
= control target key end

     0   :  { %9 = vsyncpa [#allocation3], 0  ;;  %s265_s0 = inlined_call_operand.vmem [shape: f32[2,1024], index: 0, kind: input, shape index: {}]   ;;  %s266_s1 = inlined_call_operand.hbm [shape: f32[2,1024], index: 1, kind: input, shape index: {}, may-alias: {1,3}]   ;;  %s267_s2 = inlined_call_operand.hbm [shape: bf16[2,1024], index: 2, kind: output, shape index: {0}]   ;;  %s268_s3 = inlined_call_operand.hbm [shape: f32[2,1024], index: 3, kind: output, shape index: {1}, may-alias: {1,3}]  }
   0x1   :  { %10 = vsyncpa [#allocation4], 0 }
   0x2   :  { %11 = vsyncpa [#allocation7], 0  ;;  %s19_s14 = sshll.u32 %s266_s1, 4  ;;  %s222_s15 = smov [#allocation2]   ;;  %s20_s14 = int_to_ptr.hbm [resolvable:$true] %s19_s14 }
   0x3   :  { %s21_s16 = sshll.u32 %s222_s15, 4  ;;  %s22_s16 = int_to_ptr.vmem [resolvable:$true] %s21_s16 }
   0x4   :  { %24 = dma.hbm_to_vmem [thread:$0]  %s20_s14, 256, %s22_s16, [#allocation3]  }
   0x5   :  { %216 = dma.done.wait [#allocation3], 256  }
   0x6   :  { %217 = vsyncadd [#allocation3], 4294967040  ;;  %v29_v0 = vld [vmem:[#allocation2] sm:$0xff]  ;;  %v31_v1 = vld [vmem:[%s265_s0] sm:$0xff]  ;;  %s223_s1 = smov [#allocation6]   ;;  %s123_s24 = sshll.u32 %s268_s3, 4  ;;  %s124_s24 = int_to_ptr.hbm [resolvable:$true] %s123_s24 }
   0x7   :  { %v30_v2 = vld [vmem:[#allocation2 + $0x8] sm:$0xff]  ;;  %v33_v3 = vadd.f32 %v31_v1, %v29_v0  ;;  %v32_v4 = vld [vmem:[%s265_s0 + $0x8] sm:$0xff]  ;;  %s121_s21 = sshll.u32 %s223_s1, 4  ;;  %v224_v6 = vmov 0.0   ;;  %vm77_vm2 = vcmask 1040384   ;;  %vm81_vm3 = vcmask 1042434   ;;  %s122_s21 = int_to_ptr.vmem [resolvable:$true] %s121_s21 }
   0x8   :  { %v34_v5 = vadd.f32 %v32_v4, %v30_v2  ;;  %vm85_vm4 = vcmask 1041408   ;;  %vm87_vm5 = vcmask 1044484   ;;  %vm91_vm6 = vcmask 1046534   ;;  %s225_s0 = smov [#allocation5]   ;;  %s112_s27 = sshll.u32 %s267_s2, 4  ;;  %s113_s27 = int_to_ptr.hbm [resolvable:$true] %s112_s27 }
   0x9   :  { %vm35_vm0 = vcmp.ge.f32.partialorder %v33_v3, 0.5  ;;  %vm95_vm7 = vcmask 1045508   ;;  %s110_s3 = sshll.u32 %s225_s0, 4  ;;  %vm97_vm8 = vcmask 1043456   ;;  %s111_s3 = int_to_ptr.vmem [resolvable:$true] %s110_s3 }
   0xa   :  { %v138_v7 = vsel %vm35_vm0, 1.0, %v224_v6  ;;  %vm36_vm1 = vcmp.ge.f32.partialorder %v34_v5, 0.5  ;;  %v101_v8 = vsel %vm35_vm0, 0.0, %v33_v3 }
   0xb   :  { %43 = vst [vmem:[#allocation1] ss:$4 sm:$0xff] %v138_v7  ;;  %v139_v9 = vsel %vm36_vm1, 1.0, %v224_v6  ;;  %v102_v10 = vsel %vm36_vm1, 0.0, %v34_v5 }
   0xc   :  { %45 = vst [vmem:[#allocation1 + $0x20] ss:$4 sm:$0xff] %v139_v9 }
   0xd   :  { %103 = vst [vmem:[#allocation6] sm:$0xff] %v101_v8 }
   0xe   :  { %104 = vst [vmem:[#allocation6 + $0x8] sm:$0xff] %v102_v10 }
   0xf   :  { %126 = dma.vmem_to_hbm [thread:$0]  %s122_s21, 256, %s124_s24, [#allocation7]  }
  0x12   :  { %v46_v11 = vld.sshfl [vmem:[#allocation1] sm:$0xff pattern:$0x73625140]  ;;  %v47_v12 = vld.sshfl [vmem:[#allocation1 + $0x8] sm:$0xff pattern:$0x73625140] }
  0x13   :  { %v48_v13 = vld.sshfl [vmem:[#allocation1 + $0x10] sm:$0xff pattern:$0x73625140]  ;;  %v49_v14 = vld.sshfl [vmem:[#allocation1 + $0x18] sm:$0xff pattern:$0x73625140]  ;;  %v62_v15 = vpack.c.bf16 %v47_v12, %v46_v11 }
  0x14   :  { %v50_v16 = vld.sshfl [vmem:[#allocation1 + $0x20] sm:$0xff pattern:$0x73625140]  ;;  %v51_v17 = vld.sshfl [vmem:[#allocation1 + $0x28] sm:$0xff pattern:$0x73625140]  ;;  %v63_v18 = vpack.c.bf16 %v49_v14, %v48_v13 }
  0x15   :  { %v52_v19 = vld.sshfl [vmem:[#allocation1 + $0x30] sm:$0xff pattern:$0x73625140]  ;;  %v53_v20 = vld.sshfl [vmem:[#allocation1 + $0x38] sm:$0xff pattern:$0x73625140]  ;;  %v64_v21 = vpack.c.bf16 %v51_v17, %v50_v16 }
  0x16   :  { %v65_v22 = vpack.c.bf16 %v53_v20, %v52_v19  ;;  %v70_v23 = vrot.slane %v62_v15, 3  ;;  %v71_v24 = vrot.slane %v63_v18, 6  ;;  %v72_v25 = vrot.slane %v63_v18, 1 }
  0x17   :  { %v73_v26 = vrot.slane %v64_v21, 4  ;;  %v74_v27 = vrot.slane %v64_v21, 7 }
  0x18   :  { %v75_v28 = vrot.slane %v65_v22, 2  ;;  %v76_v29 = vrot.slane %v65_v22, 5  ;;  %v80_v30 = vsel %vm77_vm2, %v62_v15, %v70_v23  ;;  %v84_v31 = vsel %vm81_vm3, %v71_v24, %v72_v25 }
  0x19   :  { %v86_v32 = vsel %vm85_vm4, %v80_v30, %v84_v31  ;;  %v90_v33 = vsel %vm87_vm5, %v73_v26, %v74_v27 }
  0x1a   :  { %v94_v34 = vsel %vm91_vm6, %v75_v28, %v76_v29 }
  0x1b   :  { %v96_v35 = vsel %vm95_vm7, %v90_v33, %v94_v34 }
  0x1c   :  { %v98_v36 = vsel %vm97_vm8, %v86_v32, %v96_v35 }
  0x1d   :  { %100 = vst [vmem:[#allocation5] sm:$0xff] %v98_v36 }
  0x1e   :  { %115 = dma.vmem_to_hbm [thread:$0]  %s111_s3, 128, %s113_s27, [#allocation4]  }
  0x1f   :  { %218 = dma.done.wait [#allocation4], 128  }
  0x20   :  { %219 = vsyncadd [#allocation4], 4294967168 }
  0x21   :  { %220 = dma.done.wait [#allocation7], 256  }
  0x22   :  { %221 = vsyncadd [#allocation7], 4294967040 }
  0x23   :  { %135 = vsyncpa [#allocation3], 1 }
  0x24   :  { %136 = vsyncpa [#allocation4], 1 }
  0x25   :  { %137 = vsyncpa [#allocation7], 1 }

</bundles_post_ra>
